<compile_context>
chip_gen: v7x
topology: tpu7x:2x2x1
jax: 0.10.0
libtpu: 0.0.40
codegen_flags: <defaults>
</compile_context>

<pallas_src>
import jax
import jax.numpy as jnp
from jax.experimental import pallas as pl
from jax.experimental.pallas import tpu as pltpu


def _round_up(x, m):
    return ((x + m - 1) // m) * m


def _cardio_resp_kernel(
    merged_ref, feat3_ref,
    s1_ref, b1_ref, w1_ref, c1_ref,      # layer 1: BN-fold scale/bias, Linear W/b
    sm_ref, bm_ref, wm_ref, cm_ref,      # layers 2..n-1 stacked: (L,1,HP),(L,1,HP),(L,HP,HP),(L,1,HP)
    w5_ref, c5_ref,                      # final Linear
    out_ref, concat_ref,
):
    f32 = jnp.float32
    mxu_dtype = w1_ref.dtype             # bf16 weights -> native MXU operands

    # Build the concat in registers; write the output block exactly once and
    # never read it back.
    x = jnp.concatenate(
        [merged_ref[...].astype(f32), feat3_ref[...].astype(f32)], axis=-1)
    concat_ref[...] = x.astype(concat_ref.dtype)

    # Layer 1: folded BatchNorm1d (eval) -> ReLU -> Linear(Dc -> HP).
    # Elementwise math stays f32; only the matmul operands go bf16.
    h = jnp.maximum(x * s1_ref[...] + b1_ref[...], 0.0)
    x = jnp.dot(h.astype(mxu_dtype), w1_ref[...],
                preferred_element_type=f32) + c1_ref[...]

    # Middle layers (HP -> HP), statically unrolled (tiny trip count).
    for l in range(wm_ref.shape[0]):
        h = jnp.maximum(x * sm_ref[l] + bm_ref[l], 0.0)
        x = jnp.dot(h.astype(mxu_dtype), wm_ref[l],
                    preferred_element_type=f32) + cm_ref[l]

    # Final Linear(HP -> num_classes)
    out = jnp.dot(x.astype(mxu_dtype), w5_ref[...],
                  preferred_element_type=f32) + c5_ref[...]
    out_ref[...] = out.astype(out_ref.dtype)


def cardio_resp_regression2_pallas(merged, feature, params, *, block_m=512):
    """merged: (B, D1); feature: (B, F) with F >= 3.
    Returns (out (B, num_classes) f32, concat_feature (B, D1+3))."""
    B, d1 = merged.shape
    nf = feature.shape[1]
    assert nf >= 3, "feature must have at least 3 columns"
    s1, b1, w1, c1, sm, bm, wm, cm, w5, c5 = params
    dc = d1 + 3
    assert s1.shape[1] == dc, "model input_dim must equal merged_dim + 3"
    num_classes = w5.shape[1]

    # Only the first 3 feature columns are used: slice wrapper-side so the
    # kernel never DMAs the unused columns.
    feat3 = feature[:, :3]

    # Batch tile: whole batch when tiny; otherwise >= 2 grid steps (so both
    # v7x TensorCores get work), capped at block_m rows.  Working set
    # (weights + one tile) is far under every generation's VMEM budget.
    if B <= 8:
        bm_rows = B
    else:
        bm_rows = min(block_m, _round_up(pl.cdiv(B, 2), 8))
    grid = (pl.cdiv(B, bm_rows),)

    def row_spec(cols):
        return pl.BlockSpec((bm_rows, cols), lambda i: (i, 0))

    def const_spec(arr):
        nd = arr.ndim
        return pl.BlockSpec(arr.shape, lambda i, _nd=nd: (0,) * _nd)

    concat_dtype = jnp.promote_types(merged.dtype, feature.dtype)
    out_dtype = jnp.promote_types(concat_dtype, jnp.float32)
    out_shapes = (
        jax.ShapeDtypeStruct((B, num_classes), out_dtype),
        jax.ShapeDtypeStruct((B, dc), concat_dtype),
    )

    return pl.pallas_call(
        _cardio_resp_kernel,
        out_shape=out_shapes,
        grid=grid,
        in_specs=[
            row_spec(d1),
            row_spec(3),
            const_spec(s1), const_spec(b1), const_spec(w1), const_spec(c1),
            const_spec(sm), const_spec(bm), const_spec(wm), const_spec(cm),
            const_spec(w5), const_spec(c5),
        ],
        out_specs=(row_spec(num_classes), row_spec(dc)),
        compiler_params=pltpu.CompilerParams(
            dimension_semantics=("parallel",)),
    )(merged, feat3, s1, b1, w1, c1, sm, bm, wm, cm, w5, c5)


class CardioRespRegression2Pallas:
    """JAX/Pallas port of CardioRespRegression2 (eval-mode, BN folded)."""

    def __init__(self, training_params=None, num_classes=10, input_dim=10,
                 hidden_dim=100, n_layers=5, key=None,
                 weight_dtype=jnp.bfloat16):
        # input_dim is the concat width (merged_dim + 3), as in the PyTorch ctor.
        del training_params  # unused by the PyTorch forward as well
        if key is None:
            key = jax.random.PRNGKey(0)
        eps = 1e-5
        hp = _round_up(hidden_dim, 128)       # lane-dense hidden tiles
        keys = iter(jax.random.split(key, 8 * n_layers + 8))
        dims = [input_dim] + [hidden_dim] * (n_layers - 1)

        scales, biases, weights, lin_biases = [], [], [], []
        for i in range(n_layers - 1):
            din = dims[i]
            gamma = 1.0 + 0.1 * jax.random.normal(next(keys), (din,), jnp.float32)
            beta = 0.1 * jax.random.normal(next(keys), (din,), jnp.float32)
            rmean = 0.1 * jax.random.normal(next(keys), (din,), jnp.float32)
            rvar = 1.0 + 0.1 * jnp.abs(jax.random.normal(next(keys), (din,), jnp.float32))
            scale = gamma / jnp.sqrt(rvar + eps)
            bias = beta - rmean * scale
            bound = 1.0 / (din ** 0.5)
            w = jax.random.uniform(next(keys), (din, hidden_dim), jnp.float32,
                                   -bound, bound)
            b = jax.random.uniform(next(keys), (hidden_dim,), jnp.float32,
                                   -bound, bound)

            if i == 0:
                # Layer 1: exact concat width on the input side; pad only the
                # hidden (output) side to hp with zeros.
                s_row = scale.reshape(1, din)
                b_row = bias.reshape(1, din)
                w_pad = jnp.zeros((din, hp), jnp.float32).at[:, :hidden_dim].set(w)
            else:
                # Middle layers: pad both sides to hp with zeros.
                s_row = jnp.zeros((1, hp), jnp.float32).at[0, :hidden_dim].set(scale)
                b_row = jnp.zeros((1, hp), jnp.float32).at[0, :hidden_dim].set(bias)
                w_pad = (jnp.zeros((hp, hp), jnp.float32)
                         .at[:hidden_dim, :hidden_dim].set(w))
            c_row = jnp.zeros((1, hp), jnp.float32).at[0, :hidden_dim].set(b)

            scales.append(s_row.astype(jnp.float32))      # elementwise stays f32
            biases.append(b_row.astype(jnp.float32))
            weights.append(w_pad.astype(weight_dtype))    # MXU operands bf16
            lin_biases.append(c_row.astype(jnp.float32))

        bound = 1.0 / (hidden_dim ** 0.5)
        w5 = jax.random.uniform(next(keys), (hidden_dim, num_classes), jnp.float32,
                                -bound, bound)
        c5 = jax.random.uniform(next(keys), (num_classes,), jnp.float32,
                                -bound, bound)
        w5_pad = jnp.zeros((hp, num_classes), jnp.float32).at[:hidden_dim, :].set(w5)

        # Layer 1 separate (different input dim); layers 2..n-1 stacked.
        self.s1, self.b1 = scales[0], biases[0]
        self.w1, self.c1 = weights[0], lin_biases[0]
        self.sm = jnp.stack(scales[1:], axis=0)
        self.bm = jnp.stack(biases[1:], axis=0)
        self.wm = jnp.stack(weights[1:], axis=0)
        self.cm = jnp.stack(lin_biases[1:], axis=0)
        self.w5 = w5_pad.astype(weight_dtype)
        self.c5 = c5.reshape(1, num_classes).astype(jnp.float32)

    def params(self):
        return (self.s1, self.b1, self.w1, self.c1,
                self.sm, self.bm, self.wm, self.cm, self.w5, self.c5)

    def __call__(self, merged_deep_features, feature):
        return cardio_resp_regression2_pallas(merged_deep_features, feature,
                                               self.params())

    def reference(self, merged, feature):
        """Plain-JAX reference of the same eval-mode forward (bf16 matmul
        operands, f32 accumulation), mirroring the kernel numerics."""
        f32 = jnp.float32
        concat = jnp.concatenate([merged, feature[:, :3]], axis=-1)
        x = concat.astype(f32)
        h = jnp.maximum(x * self.s1 + self.b1, 0.0)
        x = jnp.dot(h.astype(self.w1.dtype), self.w1,
                    preferred_element_type=f32) + self.c1
        for l in range(self.wm.shape[0]):
            h = jnp.maximum(x * self.sm[l] + self.bm[l], 0.0)
            x = jnp.dot(h.astype(self.wm.dtype), self.wm[l],
                        preferred_element_type=f32) + self.cm[l]
        out = jnp.dot(x.astype(self.w5.dtype), self.w5,
                      preferred_element_type=f32) + self.c5
        return out, concat


if __name__ == "__main__":
    key = jax.random.PRNGKey(0)
    k_model, k_m1, k_f1, k_m2, k_f2 = jax.random.split(key, 5)

    merged_dim = 7            # merged_deep_features width
    num_feature_cols = 6      # feature width (only first 3 columns are used)
    num_classes = 10
    input_dim = merged_dim + 3  # concat width, matches PyTorch ctor arg

    model = CardioRespRegression2Pallas(
        training_params={}, num_classes=num_classes, input_dim=input_dim,
        hidden_dim=100, n_layers=5, key=k_model)

    # Two batch sizes: tiny (single grid step) and one that exercises the
    # multi-step "parallel" grid path.
    for B, km, kf in [(8, k_m1, k_f1), (48, k_m2, k_f2)]:
        merged = jax.random.normal(km, (B, merged_dim), jnp.float32)
        feature = jax.random.normal(kf, (B, num_feature_cols), jnp.float32)

        out, concat_feature = model(merged, feature)
        jax.block_until_ready(out)
        jax.block_until_ready(concat_feature)

        ref_out, ref_concat = model.reference(merged, feature)
        assert out.shape == (B, num_classes)
        assert concat_feature.shape == (B, input_dim)
        assert jnp.allclose(concat_feature, ref_concat, rtol=1e-6, atol=1e-6)
        # Loose tolerance: MXU vs XLA bf16-matmul accumulation order may differ.
        assert jnp.allclose(out, ref_out.astype(out.dtype), rtol=2e-2, atol=2e-2)

    print("KERNEL_OK")
</pallas_src>

<mosaic_0001>
module attributes {stable_mosaic.version = 11 : i64} {
  func.func @_cardio_resp_kernel(%arg0: i32, %arg1: memref<8x7xf32, #tpu.memory_space<vmem>>, %arg2: memref<8x3xf32, #tpu.memory_space<vmem>>, %arg3: memref<1x10xf32, #tpu.memory_space<vmem>>, %arg4: memref<1x10xf32, #tpu.memory_space<vmem>>, %arg5: memref<10x128xbf16, #tpu.memory_space<vmem>>, %arg6: memref<1x128xf32, #tpu.memory_space<vmem>>, %arg7: memref<3x1x128xf32, #tpu.memory_space<vmem>>, %arg8: memref<3x1x128xf32, #tpu.memory_space<vmem>>, %arg9: memref<3x128x128xbf16, #tpu.memory_space<vmem>>, %arg10: memref<3x1x128xf32, #tpu.memory_space<vmem>>, %arg11: memref<128x10xbf16, #tpu.memory_space<vmem>>, %arg12: memref<1x10xf32, #tpu.memory_space<vmem>>, %arg13: memref<8x10xf32, #tpu.memory_space<vmem>>, %arg14: memref<8x10xf32, #tpu.memory_space<vmem>>) attributes {dimension_semantics = [#tpu.dimension_semantics<parallel>], iteration_bounds = array<i64: 1>, scalar_prefetch = 0 : i64, scratch_operands = 0 : i64, tpu.core_type = #tpu.core_type<tc>, window_params = [{transform_indices = @transform_0, window_bounds = array<i64: 8, 7>}, {transform_indices = @transform_1, window_bounds = array<i64: 8, 3>}, {pipeline_mode = #tpu.pipeline_mode<synchronous>, transform_indices = @transform_2, window_bounds = array<i64: 1, 10>}, {pipeline_mode = #tpu.pipeline_mode<synchronous>, transform_indices = @transform_3, window_bounds = array<i64: 1, 10>}, {pipeline_mode = #tpu.pipeline_mode<synchronous>, transform_indices = @transform_4, window_bounds = array<i64: 10, 128>}, {pipeline_mode = #tpu.pipeline_mode<synchronous>, transform_indices = @transform_5, window_bounds = array<i64: 1, 128>}, {pipeline_mode = #tpu.pipeline_mode<synchronous>, transform_indices = @transform_6, window_bounds = array<i64: 3, 1, 128>}, {pipeline_mode = #tpu.pipeline_mode<synchronous>, transform_indices = @transform_7, window_bounds = array<i64: 3, 1, 128>}, {pipeline_mode = #tpu.pipeline_mode<synchronous>, transform_indices = @transform_8, window_bounds = array<i64: 3, 128, 128>}, {pipeline_mode = #tpu.pipeline_mode<synchronous>, transform_indices = @transform_9, window_bounds = array<i64: 3, 1, 128>}, {pipeline_mode = #tpu.pipeline_mode<synchronous>, transform_indices = @transform_10, window_bounds = array<i64: 128, 10>}, {pipeline_mode = #tpu.pipeline_mode<synchronous>, transform_indices = @transform_11, window_bounds = array<i64: 1, 10>}, {transform_indices = @transform_12, window_bounds = array<i64: 8, 10>}, {transform_indices = @transform_13, window_bounds = array<i64: 8, 10>}]} {
    %c0 = arith.constant 0 : index
    %c0_0 = arith.constant 0 : index
    %0 = vector.load %arg1[%c0, %c0_0] : memref<8x7xf32, #tpu.memory_space<vmem>>, vector<8x7xf32>
    %c0_1 = arith.constant 0 : index
    %c0_2 = arith.constant 0 : index
    %1 = vector.load %arg2[%c0_1, %c0_2] : memref<8x3xf32, #tpu.memory_space<vmem>>, vector<8x3xf32>
    %2 = tpu.concatenate %0, %1 in 1 : vector<8x7xf32>, vector<8x3xf32> -> vector<8x10xf32>
    %c0_3 = arith.constant 0 : index
    %c0_4 = arith.constant 0 : index
    %3 = vector.load %arg14[%c0_3, %c0_4] : memref<8x10xf32, #tpu.memory_space<vmem>>, vector<8x10xf32>
    tpu.vector_store %arg14[%c0_3, %c0_4], %2 {strides = array<i32>} : memref<8x10xf32, #tpu.memory_space<vmem>>, vector<8x10xf32>,
    %c0_5 = arith.constant 0 : index
    %c0_6 = arith.constant 0 : index
    %4 = vector.load %arg3[%c0_5, %c0_6] : memref<1x10xf32, #tpu.memory_space<vmem>>, vector<1x10xf32>
    %5 = vector.broadcast %4 : vector<1x10xf32> to vector<8x10xf32>
    %6 = arith.mulf %2, %5 : vector<8x10xf32>
    %c0_7 = arith.constant 0 : index
    %c0_8 = arith.constant 0 : index
    %7 = vector.load %arg4[%c0_7, %c0_8] : memref<1x10xf32, #tpu.memory_space<vmem>>, vector<1x10xf32>
    %8 = vector.broadcast %7 : vector<1x10xf32> to vector<8x10xf32>
    %9 = arith.addf %6, %8 : vector<8x10xf32>
    %cst = arith.constant 0.000000e+00 : f32
    %10 = vector.broadcast %cst : f32 to vector<8x10xf32>
    %11 = arith.maximumf %9, %10 : vector<8x10xf32>
    %12 = arith.truncf %11 : vector<8x10xf32> to vector<8x10xbf16>
    %c0_9 = arith.constant 0 : index
    %c0_10 = arith.constant 0 : index
    %13 = vector.load %arg5[%c0_9, %c0_10] : memref<10x128xbf16, #tpu.memory_space<vmem>>, vector<10x128xbf16>
    %cst_11 = arith.constant dense<0.000000e+00> : vector<8x128xf32>
    %14 = tpu.matmul %12, %13, %cst_11 {dimension_numbers = #tpu.dot_dimension_numbers<[1], [0], [0], [1], [0, 0, 1, 1], [], []>} : vector<8x10xbf16>, vector<10x128xbf16>, vector<8x128xf32> -> vector<8x128xf32>
    %c0_12 = arith.constant 0 : index
    %c0_13 = arith.constant 0 : index
    %15 = vector.load %arg6[%c0_12, %c0_13] : memref<1x128xf32, #tpu.memory_space<vmem>>, vector<1x128xf32>
    %16 = vector.broadcast %15 : vector<1x128xf32> to vector<8x128xf32>
    %17 = arith.addf %14, %16 : vector<8x128xf32>
    %c0_14 = arith.constant 0 : index
    %c0_15 = arith.constant 0 : index
    %c0_16 = arith.constant 0 : index
    %18 = vector.load %arg7[%c0_14, %c0_15, %c0_16] : memref<3x1x128xf32, #tpu.memory_space<vmem>>, vector<1x1x128xf32>
    %19 = vector.shape_cast %18 : vector<1x1x128xf32> to vector<1x128xf32>
    %20 = vector.broadcast %19 : vector<1x128xf32> to vector<8x128xf32>
    %21 = arith.mulf %17, %20 : vector<8x128xf32>
    %c0_17 = arith.constant 0 : index
    %c0_18 = arith.constant 0 : index
    %c0_19 = arith.constant 0 : index
    %22 = vector.load %arg8[%c0_17, %c0_18, %c0_19] : memref<3x1x128xf32, #tpu.memory_space<vmem>>, vector<1x1x128xf32>
    %23 = vector.shape_cast %22 : vector<1x1x128xf32> to vector<1x128xf32>
    %24 = vector.broadcast %23 : vector<1x128xf32> to vector<8x128xf32>
    %25 = arith.addf %21, %24 : vector<8x128xf32>
    %cst_20 = arith.constant 0.000000e+00 : f32
    %26 = vector.broadcast %cst_20 : f32 to vector<8x128xf32>
    %27 = arith.maximumf %25, %26 : vector<8x128xf32>
    %28 = arith.truncf %27 : vector<8x128xf32> to vector<8x128xbf16>
    %c0_21 = arith.constant 0 : index
    %c0_22 = arith.constant 0 : index
    %c0_23 = arith.constant 0 : index
    %29 = vector.load %arg9[%c0_21, %c0_22, %c0_23] : memref<3x128x128xbf16, #tpu.memory_space<vmem>>, vector<1x128x128xbf16>
    %30 = vector.shape_cast %29 : vector<1x128x128xbf16> to vector<128x128xbf16>
    %cst_24 = arith.constant dense<0.000000e+00> : vector<8x128xf32>
    %31 = tpu.matmul %28, %30, %cst_24 {dimension_numbers = #tpu.dot_dimension_numbers<[1], [0], [0], [1], [0, 0, 1, 1], [], []>} : vector<8x128xbf16>, vector<128x128xbf16>, vector<8x128xf32> -> vector<8x128xf32>
    %c0_25 = arith.constant 0 : index
    %c0_26 = arith.constant 0 : index
    %c0_27 = arith.constant 0 : index
    %32 = vector.load %arg10[%c0_25, %c0_26, %c0_27] : memref<3x1x128xf32, #tpu.memory_space<vmem>>, vector<1x1x128xf32>
    %33 = vector.shape_cast %32 : vector<1x1x128xf32> to vector<1x128xf32>
    %34 = vector.broadcast %33 : vector<1x128xf32> to vector<8x128xf32>
    %35 = arith.addf %31, %34 : vector<8x128xf32>
    %c1 = arith.constant 1 : index
    %c0_28 = arith.constant 0 : index
    %c0_29 = arith.constant 0 : index
    %36 = vector.load %arg7[%c1, %c0_28, %c0_29] : memref<3x1x128xf32, #tpu.memory_space<vmem>>, vector<1x1x128xf32>
    %37 = vector.shape_cast %36 : vector<1x1x128xf32> to vector<1x128xf32>
    %38 = vector.broadcast %37 : vector<1x128xf32> to vector<8x128xf32>
    %39 = arith.mulf %35, %38 : vector<8x128xf32>
    %c1_30 = arith.constant 1 : index
    %c0_31 = arith.constant 0 : index
    %c0_32 = arith.constant 0 : index
    %40 = vector.load %arg8[%c1_30, %c0_31, %c0_32] : memref<3x1x128xf32, #tpu.memory_space<vmem>>, vector<1x1x128xf32>
    %41 = vector.shape_cast %40 : vector<1x1x128xf32> to vector<1x128xf32>
    %42 = vector.broadcast %41 : vector<1x128xf32> to vector<8x128xf32>
    %43 = arith.addf %39, %42 : vector<8x128xf32>
    %cst_33 = arith.constant 0.000000e+00 : f32
    %44 = vector.broadcast %cst_33 : f32 to vector<8x128xf32>
    %45 = arith.maximumf %43, %44 : vector<8x128xf32>
    %46 = arith.truncf %45 : vector<8x128xf32> to vector<8x128xbf16>
    %c1_34 = arith.constant 1 : index
    %c0_35 = arith.constant 0 : index
    %c0_36 = arith.constant 0 : index
    %47 = vector.load %arg9[%c1_34, %c0_35, %c0_36] : memref<3x128x128xbf16, #tpu.memory_space<vmem>>, vector<1x128x128xbf16>
    %48 = vector.shape_cast %47 : vector<1x128x128xbf16> to vector<128x128xbf16>
    %cst_37 = arith.constant dense<0.000000e+00> : vector<8x128xf32>
    %49 = tpu.matmul %46, %48, %cst_37 {dimension_numbers = #tpu.dot_dimension_numbers<[1], [0], [0], [1], [0, 0, 1, 1], [], []>} : vector<8x128xbf16>, vector<128x128xbf16>, vector<8x128xf32> -> vector<8x128xf32>
    %c1_38 = arith.constant 1 : index
    %c0_39 = arith.constant 0 : index
    %c0_40 = arith.constant 0 : index
    %50 = vector.load %arg10[%c1_38, %c0_39, %c0_40] : memref<3x1x128xf32, #tpu.memory_space<vmem>>, vector<1x1x128xf32>
    %51 = vector.shape_cast %50 : vector<1x1x128xf32> to vector<1x128xf32>
    %52 = vector.broadcast %51 : vector<1x128xf32> to vector<8x128xf32>
    %53 = arith.addf %49, %52 : vector<8x128xf32>
    %c2 = arith.constant 2 : index
    %c0_41 = arith.constant 0 : index
    %c0_42 = arith.constant 0 : index
    %54 = vector.load %arg7[%c2, %c0_41, %c0_42] : memref<3x1x128xf32, #tpu.memory_space<vmem>>, vector<1x1x128xf32>
    %55 = vector.shape_cast %54 : vector<1x1x128xf32> to vector<1x128xf32>
    %56 = vector.broadcast %55 : vector<1x128xf32> to vector<8x128xf32>
    %57 = arith.mulf %53, %56 : vector<8x128xf32>
    %c2_43 = arith.constant 2 : index
    %c0_44 = arith.constant 0 : index
    %c0_45 = arith.constant 0 : index
    %58 = vector.load %arg8[%c2_43, %c0_44, %c0_45] : memref<3x1x128xf32, #tpu.memory_space<vmem>>, vector<1x1x128xf32>
    %59 = vector.shape_cast %58 : vector<1x1x128xf32> to vector<1x128xf32>
    %60 = vector.broadcast %59 : vector<1x128xf32> to vector<8x128xf32>
    %61 = arith.addf %57, %60 : vector<8x128xf32>
    %cst_46 = arith.constant 0.000000e+00 : f32
    %62 = vector.broadcast %cst_46 : f32 to vector<8x128xf32>
    %63 = arith.maximumf %61, %62 : vector<8x128xf32>
    %64 = arith.truncf %63 : vector<8x128xf32> to vector<8x128xbf16>
    %c2_47 = arith.constant 2 : index
    %c0_48 = arith.constant 0 : index
    %c0_49 = arith.constant 0 : index
    %65 = vector.load %arg9[%c2_47, %c0_48, %c0_49] : memref<3x128x128xbf16, #tpu.memory_space<vmem>>, vector<1x128x128xbf16>
    %66 = vector.shape_cast %65 : vector<1x128x128xbf16> to vector<128x128xbf16>
    %cst_50 = arith.constant dense<0.000000e+00> : vector<8x128xf32>
    %67 = tpu.matmul %64, %66, %cst_50 {dimension_numbers = #tpu.dot_dimension_numbers<[1], [0], [0], [1], [0, 0, 1, 1], [], []>} : vector<8x128xbf16>, vector<128x128xbf16>, vector<8x128xf32> -> vector<8x128xf32>
    %c2_51 = arith.constant 2 : index
    %c0_52 = arith.constant 0 : index
    %c0_53 = arith.constant 0 : index
    %68 = vector.load %arg10[%c2_51, %c0_52, %c0_53] : memref<3x1x128xf32, #tpu.memory_space<vmem>>, vector<1x1x128xf32>
    %69 = vector.shape_cast %68 : vector<1x1x128xf32> to vector<1x128xf32>
    %70 = vector.broadcast %69 : vector<1x128xf32> to vector<8x128xf32>
    %71 = arith.addf %67, %70 : vector<8x128xf32>
    %72 = arith.truncf %71 : vector<8x128xf32> to vector<8x128xbf16>
    %c0_54 = arith.constant 0 : index
    %c0_55 = arith.constant 0 : index
    %73 = vector.load %arg11[%c0_54, %c0_55] : memref<128x10xbf16, #tpu.memory_space<vmem>>, vector<128x10xbf16>
    %cst_56 = arith.constant dense<0.000000e+00> : vector<8x10xf32>
    %74 = tpu.matmul %72, %73, %cst_56 {dimension_numbers = #tpu.dot_dimension_numbers<[1], [0], [0], [1], [0, 0, 1, 1], [], []>} : vector<8x128xbf16>, vector<128x10xbf16>, vector<8x10xf32> -> vector<8x10xf32>
    %c0_57 = arith.constant 0 : index
    %c0_58 = arith.constant 0 : index
    %75 = vector.load %arg12[%c0_57, %c0_58] : memref<1x10xf32, #tpu.memory_space<vmem>>, vector<1x10xf32>
    %76 = vector.broadcast %75 : vector<1x10xf32> to vector<8x10xf32>
    %77 = arith.addf %74, %76 : vector<8x10xf32>
    %c0_59 = arith.constant 0 : index
    %c0_60 = arith.constant 0 : index
    %78 = vector.load %arg13[%c0_59, %c0_60] : memref<8x10xf32, #tpu.memory_space<vmem>>, vector<8x10xf32>
    tpu.vector_store %arg13[%c0_59, %c0_60], %77 {strides = array<i32>} : memref<8x10xf32, #tpu.memory_space<vmem>>, vector<8x10xf32>,
    return
  }
  func.func @transform_0(%arg0: i32) -> (i32, i32) {
    %c0_i32 = arith.constant 0 : i32
    %c0_i32_0 = arith.constant 0 : i32
    return %arg0, %c0_i32 : i32, i32
  }
  func.func @transform_1(%arg0: i32) -> (i32, i32) {
    %c0_i32 = arith.constant 0 : i32
    %c0_i32_0 = arith.constant 0 : i32
    return %arg0, %c0_i32 : i32, i32
  }
  func.func @transform_2(%arg0: i32) -> (i32, i32) {
    %c0_i32 = arith.constant 0 : i32
    %c0_i32_0 = arith.constant 0 : i32
    %c0_i32_1 = arith.constant 0 : i32
    return %c0_i32, %c0_i32_0 : i32, i32
  }
  func.func @transform_3(%arg0: i32) -> (i32, i32) {
    %c0_i32 = arith.constant 0 : i32
    %c0_i32_0 = arith.constant 0 : i32
    %c0_i32_1 = arith.constant 0 : i32
    return %c0_i32, %c0_i32_0 : i32, i32
  }
  func.func @transform_4(%arg0: i32) -> (i32, i32) {
    %c0_i32 = arith.constant 0 : i32
    %c0_i32_0 = arith.constant 0 : i32
    %c0_i32_1 = arith.constant 0 : i32
    return %c0_i32, %c0_i32_0 : i32, i32
  }
  func.func @transform_5(%arg0: i32) -> (i32, i32) {
    %c0_i32 = arith.constant 0 : i32
    %c0_i32_0 = arith.constant 0 : i32
    %c0_i32_1 = arith.constant 0 : i32
    return %c0_i32, %c0_i32_0 : i32, i32
  }
  func.func @transform_6(%arg0: i32) -> (i32, i32, i32) {
    %c0_i32 = arith.constant 0 : i32
    %c0_i32_0 = arith.constant 0 : i32
    %c0_i32_1 = arith.constant 0 : i32
    %c0_i32_2 = arith.constant 0 : i32
    return %c0_i32, %c0_i32_0, %c0_i32_1 : i32, i32, i32
  }
  func.func @transform_7(%arg0: i32) -> (i32, i32, i32) {
    %c0_i32 = arith.constant 0 : i32
    %c0_i32_0 = arith.constant 0 : i32
    %c0_i32_1 = arith.constant 0 : i32
    %c0_i32_2 = arith.constant 0 : i32
    return %c0_i32, %c0_i32_0, %c0_i32_1 : i32, i32, i32
  }
  func.func @transform_8(%arg0: i32) -> (i32, i32, i32) {
    %c0_i32 = arith.constant 0 : i32
    %c0_i32_0 = arith.constant 0 : i32
    %c0_i32_1 = arith.constant 0 : i32
    %c0_i32_2 = arith.constant 0 : i32
    return %c0_i32, %c0_i32_0, %c0_i32_1 : i32, i32, i32
  }
  func.func @transform_9(%arg0: i32) -> (i32, i32, i32) {
    %c0_i32 = arith.constant 0 : i32
    %c0_i32_0 = arith.constant 0 : i32
    %c0_i32_1 = arith.constant 0 : i32
    %c0_i32_2 = arith.constant 0 : i32
    return %c0_i32, %c0_i32_0, %c0_i32_1 : i32, i32, i32
  }
  func.func @transform_10(%arg0: i32) -> (i32, i32) {
    %c0_i32 = arith.constant 0 : i32
    %c0_i32_0 = arith.constant 0 : i32
    %c0_i32_1 = arith.constant 0 : i32
    return %c0_i32, %c0_i32_0 : i32, i32
  }
  func.func @transform_11(%arg0: i32) -> (i32, i32) {
    %c0_i32 = arith.constant 0 : i32
    %c0_i32_0 = arith.constant 0 : i32
    %c0_i32_1 = arith.constant 0 : i32
    return %c0_i32, %c0_i32_0 : i32, i32
  }
  func.func @transform_12(%arg0: i32) -> (i32, i32) {
    %c0_i32 = arith.constant 0 : i32
    %c0_i32_0 = arith.constant 0 : i32
    return %arg0, %c0_i32 : i32, i32
  }
  func.func @transform_13(%arg0: i32) -> (i32, i32) {
    %c0_i32 = arith.constant 0 : i32
    %c0_i32_0 = arith.constant 0 : i32
    return %arg0, %c0_i32 : i32, i32
  }
}

</mosaic_0001>

<bundles_post_ra>
// kernel: tpu_custom_call.1
= control target key start
LH: loop header
LB: loop body
LE: loop exit
PB: predicated region body
PF: predicated region fallthrough
CT: control target
= control target key end

     0   :  { %19 = vsyncpa [#allocation3], 0  ;;  %s1208_s0 = inlined_call_operand.vmem [shape: f32[8,7], index: 0, kind: input, shape index: {}]   ;;  %s1209_s1 = inlined_call_operand.vmem [shape: f32[8,3], index: 1, kind: input, shape index: {}]   ;;  %s1210_s2 = inlined_call_operand.vmem [shape: f32[1,10], index: 2, kind: input, shape index: {}]   ;;  %s1211_s3 = inlined_call_operand.vmem [shape: f32[1,10], index: 3, kind: input, shape index: {}]   ;;  %s1212_s4 = inlined_call_operand.vmem [shape: bf16[10,128], index: 4, kind: input, shape index: {}]   ;;  %s1213_s5 = inlined_call_operand.vmem [shape: f32[1,128], index: 5, kind: input, shape index: {}]   ;;  %s1214_s6 = inlined_call_operand.vmem [shape: f32[3,1,128], index: 6, kind: input, shape index: {}]   ;;  %s1215_s7 = inlined_call_operand.vmem [shape: f32[3,1,128], index: 7, kind: input, shape index: {}]   ;;  %s1216_s8 = inlined_call_operand.hbm [shape: bf16[3,128,128], index: 8, kind: input, shape index: {}]   ;;  %s1217_s9 = inlined_call_operand.vmem [shape: f32[3,1,128], index: 9, kind: input, shape index: {}]   ;;  %s1218_s10 = inlined_call_operand.vmem [shape: bf16[128,10], index: 10, kind: input, shape index: {}]   ;;  %s1219_s11 = inlined_call_operand.vmem [shape: f32[1,10], index: 11, kind: input, shape index: {}]   ;;  %s1220_s12 = inlined_call_operand.hbm [shape: f32[8,10], index: 12, kind: output, shape index: {0}]   ;;  %s1221_s13 = inlined_call_operand.hbm [shape: f32[8,10], index: 13, kind: output, shape index: {1}]  }
   0x1   :  { %20 = vsyncpa [#allocation4], 0 }
   0x2   :  { %21 = vsyncpa [#allocation7], 0  ;;  %s976_s25 = smov [#allocation2]   ;;  %s904_s29 = scalar_lea.hbm %s1216_s8, 3072 }
   0x3   :  { %s43_s26 = sshll.u32 %s976_s25, 4  ;;  %p905_p0 = scmp.ne.s32.totalorder %s1216_s8, %s904_s29  ;;  %s44_s26 = int_to_ptr.vmem [resolvable:$true] %s43_s26 }
   0x4   :  { %p908_p1 = scmp.lt.u32.totalorder %s904_s29, %s1216_s8 }
   0x6   :  { %p910_p2 = pnand %p908_p1, %p905_p0 }
   0x8   :  { %913 = shalt.err (!%p910_p2)
}
   0x9   :  { %s914_s17 = scalar_lea.vmem %s44_s26, 3072  ;;  %p919_p4 = scmp.lt.s32.totalorder %s44_s26, %s44_s26 }
   0xa   :  { %p915_p3 = scmp.ne.s32.totalorder %s44_s26, %s914_s17  ;;  %p920_p5 = scmp.lt.s32.totalorder %s914_s17, %s914_s17 }
   0xc   :  { %p921_p6 = por %p920_p5, %p919_p4 }
   0xe   :  { %p922_p7 = pnand %p921_p6, %p915_p3 }
  0x10   :  { %925 = shalt.err (!%p922_p7)
}
  0x11   :  { %s977_s18 = smov 64   ;;  %s978_s19 = smov 4  }
  0x12   :  { %49 = dma.hbm_to_vmem [thread:$0]  %s1216_s8, 3072, %s44_s26, [#allocation3], %s977_s18, %s977_s18, %s978_s19  }
  0x13   :  { %970 = dma.done.wait [#allocation3], 3072  }
  0x14   :  { %971 = vsyncadd [#allocation3], 4294964224  ;;  %v979_v0 = vmov 0.0   ;;  %vm980_vm0 = vmmov 0   ;;  %v61_v1 = vld [vmem:[%s1209_s1] sm:$0xff]  ;;  %s981_s24 = smov 7  }
  0x15   :  { %777 = vmatprep.subr.bf16.mxu0 %v979_v0  ;;  %783 = vmatprep.subr.bf16.mxu1 %v979_v0  ;;  %vm105_vm1 = vcmask 1044480   ;;  %v871_v2 = vld [vmem:[%s1212_s4] sm:$0x1f]   ;;  %v873_v5 = vld [vmem:[#allocation2 + $0x8] sm:$0xff]   ;;  %v874_v6 = vld [vmem:[#allocation2 + $0x10] sm:$0xff]   ;;  %vm66_vm2 = vcmask 56320  }
  0x16   :  { %779 = vmatprep.mubr.msk.bf16.mxu0 %vm980_vm0, %v979_v0  ;;  %799 = vmatprep.mubr.msk.bf16.mxu1 %vm980_vm0, %v979_v0  ;;  %v872_v3 = vld [vmem:[#allocation2] sm:$0xff]   ;;  %v107_v4 = vsel %vm105_vm1, %v871_v2, 0  ;;  %v875_v7 = vld [vmem:[#allocation2 + $0x18] sm:$0xff]   ;;  %vm68_vm3 = vcmask 80896   ;;  %v877_v18 = vld [vmem:[#allocation2 + $0x28] sm:$0xff]  }
  0x17   :  { %63 = vrot.lane.b32.xlu0 %v61_v1, %s981_s24  ;;  %778 = vmatpush3.bf16.msra.mxu0 %v107_v4  ;;  %v876_v8 = vld [vmem:[#allocation2 + $0x20] sm:$0xff]   ;;  %v878_v19 = vld [vmem:[#allocation2 + $0x30] sm:$0xff]   ;;  %v879_v20 = vld [vmem:[#allocation2 + $0x38] sm:$0xff]  }
  0x18   :  { %784 = vmatpush3.bf16.msra.mxu1 %v872_v3  ;;  %803 = vmatprep.subr.bf16.mxu0 %v979_v0  ;;  %v60_v9 = vld [vmem:[%s1208_s0] sm:$0xff]  ;;  %v881_v22 = vld [vmem:[#allocation2 + $0x48] sm:$0xff]   ;;  %v882_v23 = vld [vmem:[#allocation2 + $0x50] sm:$0xff]  }
  0x19   :  { %785 = vmatprep.subr.bf16.mxu1 %v979_v0  ;;  %v686_v10 = vld [vmem:[%s1210_s2] ss:$0 sm:$0xff]  ;;  %v883_v24 = vld [vmem:[#allocation2 + $0x58] sm:$0xff]   ;;  %v885_v38 = vld [vmem:[#allocation2 + $0x68] sm:$0xff]  }
  0x1a   :  { %v687_v13 = vld [vmem:[%s1211_s3] ss:$0 sm:$0xff]  ;;  %v886_v39 = vld [vmem:[#allocation2 + $0x70] sm:$0xff]   ;;  %v887_v40 = vld [vmem:[#allocation2 + $0x78] sm:$0xff]  }
  0x1b   :  { %v880_v21 = vld [vmem:[#allocation2 + $0x40] sm:$0xff]   ;;  %v889_v42 = vld [vmem:[#allocation2 + $0x88] sm:$0xff]   ;;  %v890_v43 = vld [vmem:[#allocation2 + $0x90] sm:$0xff]  }
  0x1c   :  { %786 = vmatpush3.bf16.msra.mxu1 %v873_v5  ;;  %v884_v25 = vld [vmem:[#allocation2 + $0x60] sm:$0xff]   ;;  %v891_v44 = vld [vmem:[#allocation2 + $0x98] sm:$0xff]   ;;  %v893_v58 = vld [vmem:[#allocation2 + $0xa8] sm:$0xff]  }
  0x1d   :  { %787 = vmatprep.subr.bf16.mxu1 %v979_v0  ;;  %v688_v26 = vld [vmem:[%s1213_s5] ss:$0 sm:$0xff]  ;;  %v703_v48 = vld [vmem:[%s1214_s6 + $0x1] ss:$0 sm:$0xff]  ;;  %v894_v59 = vld [vmem:[#allocation2 + $0xb0] sm:$0xff]  }
  0x1e   :  { %v691_v28 = vld [vmem:[%s1214_s6] ss:$0 sm:$0xff]  ;;  %v705_v51 = vld [vmem:[%s1215_s7 + $0x1] ss:$0 sm:$0xff]  ;;  %v895_v60 = vld [vmem:[#allocation2 + $0xb8] sm:$0xff]  }
  0x1f   :  { %v692_v31 = vld [vmem:[%s1215_s7] ss:$0 sm:$0xff]  ;;  %v897_v62 = vld [vmem:[%s1218_s10 + $0x8] sm:$0xff]   ;;  %v898_v63 = vld [vmem:[%s1218_s10 + $0x10] sm:$0xff]  }
  0x20   :  { %788 = vmatpush3.bf16.msra.mxu1 %v874_v6  ;;  %v888_v41 = vld [vmem:[#allocation2 + $0x80] sm:$0xff]   ;;  %v899_v1 = vld [vmem:[%s1218_s10 + $0x18] sm:$0xff]   ;;  %v901_v3 = vld [vmem:[%s1218_s10 + $0x28] sm:$0xff]  }
  0x21   :  { %789 = vmatprep.subr.bf16.mxu1 %v979_v0  ;;  %v892_v45 = vld [vmem:[#allocation2 + $0xa0] sm:$0xff]   ;;  %v902_v4 = vld [vmem:[%s1218_s10 + $0x30] sm:$0xff]  }
  0x22   :  { %v693_v46 = vld [vmem:[%s1217_s9] ss:$0 sm:$0xff]  ;;  %v707_v5 = vld [vmem:[%s1217_s9 + $0x1] ss:$0 sm:$0xff] }
  0x23   :  { %v896_v61 = vld [vmem:[%s1218_s10] sm:$0xff]  }
  0x24   :  { %790 = vmatpush3.bf16.msra.mxu1 %v875_v7  ;;  %v900_v2 = vld [vmem:[%s1218_s10 + $0x20] sm:$0xff]  }
  0x25   :  { %791 = vmatprep.subr.bf16.mxu1 %v979_v0  ;;  %v717_v7 = vld [vmem:[%s1214_s6 + $0x2] ss:$0 sm:$0xff] }
  0x28   :  { %792 = vmatpush3.bf16.msra.mxu1 %v876_v8 }
  0x29   :  { %793 = vmatprep.subr.bf16.mxu1 %v979_v0 }
  0x2c   :  { %794 = vmatpush3.bf16.msra.mxu1 %v877_v18 }
  0x2d   :  { %795 = vmatprep.subr.bf16.mxu1 %v979_v0 }
  0x30   :  { %796 = vmatpush3.bf16.msra.mxu1 %v878_v19 }
  0x31   :  { %797 = vmatprep.subr.bf16.mxu1 %v979_v0 }
  0x34   :  { %798 = vmatpush3.bf16.msra.mxu1 %v879_v20 }
  0x35   :  { %823 = vmatprep.subr.bf16.mxu1 %v979_v0 }
  0x89   :  { %v64_v11 = vpop.permute.xlu0 %63 }
  0x8a   :  { %v67_v12 = vsel %vm66_vm2, %v60_v9, %v64_v11 }
  0x8b   :  { %v77_v14 = vmul.f32 %v686_v10, %v67_v12  ;;  %69 = vst.msk [vmem:[#allocation6] sm:$0xff] %vm68_vm3, %v67_v12  ;;  %v719_v10 = vld [vmem:[%s1215_s7 + $0x2] ss:$0 sm:$0xff]  ;;  %s982_s7 = smov [#allocation6]  }
  0x8c   :  { %s673_s20 = sshll.u32 %s982_s7, 4  ;;  %s674_s20 = int_to_ptr.vmem [resolvable:$true] %s673_s20 }
  0x8d   :  { %v85_v15 = vadd.f32 %v687_v13, %v77_v14  ;;  %s926_s21 = scalar_lea.vmem %s674_s20, 128  ;;  %p931_p9 = scmp.lt.s32.totalorder %s674_s20, %s674_s20 }
  0x8e   :  { %p927_p8 = scmp.ne.s32.totalorder %s674_s20, %s926_s21  ;;  %p932_p10 = scmp.lt.s32.totalorder %s926_s21, %s926_s21 }
  0x8f   :  { %v86_v16 = vmax.f32 %v85_v15, 0.0 }
  0x90   :  { %p933_p11 = por %p932_p10, %p931_p9 }
  0x91   :  { %v87_v17 = vpack.c.bf16 %v86_v16, %v86_v16  ;;  %v903_v16 = vld [vmem:[%s1218_s10 + $0x38] sm:$0xff]  }
  0x92   :  { %p934_p12 = pnand %p933_p11, %p927_p8 }
  0x93   :  { %780 = vmatmul.mubr.msk.bf16.vlgmr.msra.gmra.mrb[0].mxu0 %vm68_vm3, %v87_v17  ;;  %v721_v17 = vld [vmem:[%s1217_s9 + $0x2] ss:$0 sm:$0xff] }
  0x94   :  { %819 = vmatprep.mubr.msk.bf16.mxu0 %vm980_vm0, %v979_v0  ;;  %804 = vmatpush3.bf16.msra.mxu0 %v880_v21 }
  0x95   :  { %805 = vmatprep.subr.bf16.mxu0 %v979_v0 }
  0x98   :  { %806 = vmatpush3.bf16.msra.mxu0 %v881_v22 }
  0x99   :  { %807 = vmatprep.subr.bf16.mxu0 %v979_v0 }
  0x9c   :  { %808 = vmatpush3.bf16.msra.mxu0 %v882_v23 }
  0x9d   :  { %809 = vmatprep.subr.bf16.mxu0 %v979_v0 }
  0xa0   :  { %810 = vmatpush3.bf16.msra.mxu0 %v883_v24 }
  0xa1   :  { %811 = vmatprep.subr.bf16.mxu0 %v979_v0 }
  0xa4   :  { %812 = vmatpush3.bf16.msra.mxu0 %v884_v25 }
  0xa5   :  { %813 = vmatprep.subr.bf16.mxu0 %v979_v0 }
  0xa8   :  { %814 = vmatpush3.bf16.msra.mxu0 %v885_v38 }
  0xa9   :  { %815 = vmatprep.subr.bf16.mxu0 %v979_v0 }
  0xac   :  { %816 = vmatpush3.bf16.msra.mxu0 %v886_v39 }
  0xad   :  { %817 = vmatprep.subr.bf16.mxu0 %v979_v0 }
  0xb0   :  { %818 = vmatpush3.bf16.msra.mxu0 %v887_v40 }
  0xb1   :  { %843 = vmatprep.subr.bf16.mxu0 %v979_v0 }
 0x166   :  { %v143_v27 = vpop.f32.mrb[0].mxu0 }
 0x167   :  { %v144_v29 = vadd.f32 %v688_v26, %v143_v27  ;;  %v781_v30 = vpop.f32.mrb[1].mxu0 }
 0x168   :  { %v146_v32 = vpop.f32.mrb[2].mxu0 }
 0x169   :  { %v156_v33 = vmul.f32 %v691_v28, %v144_v29  ;;  %v782_v34 = vpop.f32.mrb[3].mxu0 }
 0x16b   :  { %v164_v35 = vadd.f32 %v692_v31, %v156_v33 }
 0x16d   :  { %v165_v36 = vmax.f32 %v164_v35, 0.0 }
 0x16f   :  { %v166_v37 = vpack.c.bf16 %v165_v36, %v165_v36 }
 0x171   :  { %800 = vmatmul.mubr.bf16.vlgmr.msra.gmra.mrb[0].mxu1 %v166_v37 }
 0x172   :  { %839 = vmatprep.mubr.msk.bf16.mxu1 %vm980_vm0, %v979_v0  ;;  %824 = vmatpush3.bf16.msra.mxu1 %v888_v41 }
 0x173   :  { %825 = vmatprep.subr.bf16.mxu1 %v979_v0 }
 0x176   :  { %826 = vmatpush3.bf16.msra.mxu1 %v889_v42 }
 0x177   :  { %827 = vmatprep.subr.bf16.mxu1 %v979_v0 }
 0x17a   :  { %828 = vmatpush3.bf16.msra.mxu1 %v890_v43 }
 0x17b   :  { %829 = vmatprep.subr.bf16.mxu1 %v979_v0 }
 0x17e   :  { %830 = vmatpush3.bf16.msra.mxu1 %v891_v44 }
 0x17f   :  { %831 = vmatprep.subr.bf16.mxu1 %v979_v0 }
 0x182   :  { %832 = vmatpush3.bf16.msra.mxu1 %v892_v45 }
 0x183   :  { %833 = vmatprep.subr.bf16.mxu1 %v979_v0 }
 0x186   :  { %834 = vmatpush3.bf16.msra.mxu1 %v893_v58 }
 0x187   :  { %835 = vmatprep.subr.bf16.mxu1 %v979_v0 }
 0x18a   :  { %836 = vmatpush3.bf16.msra.mxu1 %v894_v59 }
 0x18b   :  { %837 = vmatprep.subr.bf16.mxu1 %v979_v0 }
 0x18e   :  { %838 = vmatpush3.bf16.msra.mxu1 %v895_v60 }
 0x244   :  { %v272_v47 = vpop.f32.mrb[0].mxu1 }
 0x245   :  { %v273_v49 = vadd.f32 %v693_v46, %v272_v47  ;;  %v801_v50 = vpop.f32.mrb[1].mxu1 }
 0x246   :  { %v275_v52 = vpop.f32.mrb[2].mxu1 }
 0x247   :  { %v286_v53 = vmul.f32 %v703_v48, %v273_v49  ;;  %v802_v54 = vpop.f32.mrb[3].mxu1 }
 0x249   :  { %v295_v55 = vadd.f32 %v705_v51, %v286_v53 }
 0x24b   :  { %v296_v56 = vmax.f32 %v295_v55, 0.0 }
 0x24d   :  { %v297_v57 = vpack.c.bf16 %v296_v56, %v296_v56 }
 0x24f   :  { %820 = vmatmul.mubr.bf16.vlgmr.msra.gmra.mrb[4].mxu0 %v297_v57 }
 0x250   :  { %859 = vmatprep.mubr.msk.bf16.mxu0 %vm980_vm0, %v979_v0  ;;  %844 = vmatpush3.bf16.msra.mxu0 %v896_v61 }
 0x251   :  { %845 = vmatprep.subr.bf16.mxu0 %v979_v0 }
 0x254   :  { %846 = vmatpush3.bf16.msra.mxu0 %v897_v62 }
 0x255   :  { %847 = vmatprep.subr.bf16.mxu0 %v979_v0 }
 0x258   :  { %848 = vmatpush3.bf16.msra.mxu0 %v898_v63 }
 0x259   :  { %849 = vmatprep.subr.bf16.mxu0 %v979_v0 }
 0x25c   :  { %850 = vmatpush3.bf16.msra.mxu0 %v899_v1 }
 0x25d   :  { %851 = vmatprep.subr.bf16.mxu0 %v979_v0 }
 0x260   :  { %852 = vmatpush3.bf16.msra.mxu0 %v900_v2 }
 0x261   :  { %853 = vmatprep.subr.bf16.mxu0 %v979_v0 }
 0x264   :  { %854 = vmatpush3.bf16.msra.mxu0 %v901_v3 }
 0x265   :  { %855 = vmatprep.subr.bf16.mxu0 %v979_v0 }
 0x268   :  { %856 = vmatpush3.bf16.msra.mxu0 %v902_v4 }
 0x269   :  { %857 = vmatprep.subr.bf16.mxu0 %v979_v0 }
 0x26c   :  { %858 = vmatpush3.bf16.msra.mxu0 %v903_v16 }
 0x322   :  { %v405_v6 = vpop.f32.mrb[4].mxu0 }
 0x323   :  { %v406_v8 = vadd.f32 %v707_v5, %v405_v6  ;;  %v821_v9 = vpop.f32.mrb[5].mxu0 }
 0x324   :  { %v408_v11 = vpop.f32.mrb[6].mxu0 }
 0x325   :  { %v419_v12 = vmul.f32 %v717_v7, %v406_v8  ;;  %v822_v13 = vpop.f32.mrb[7].mxu0 }
 0x327   :  { %v428_v14 = vadd.f32 %v719_v10, %v419_v12 }
 0x329   :  { %v429_v0 = vmax.f32 %v428_v14, 0.0 }
 0x32b   :  { %v430_v15 = vpack.c.bf16 %v429_v0, %v429_v0 }
 0x32d   :  { %840 = vmatmul.mubr.bf16.vlgmr.msra.gmra.mrb[4].mxu1 %v430_v15 }
 0x400   :  { %v538_v18 = vpop.f32.mrb[4].mxu1 }
 0x401   :  { %v539_v19 = vadd.f32 %v721_v17, %v538_v18  ;;  %v841_v20 = vpop.f32.mrb[5].mxu1 }
 0x402   :  { %v541_v21 = vpop.f32.mrb[6].mxu1 }
 0x403   :  { %v544_v22 = vpack.c.bf16 %v539_v19, %v539_v19  ;;  %v842_v23 = vpop.f32.mrb[7].mxu1 }
 0x405   :  { %860 = vmatmul.mubr.bf16.vlgmr.msra.gmra.mrb[8].mxu0 %v544_v22 }
 0x406   :  { %937 = shalt.err (!%p934_p12)
}
 0x407   :  { %s938_s9 = scalar_lea.hbm %s1221_s13, 128 }
 0x408   :  { %p939_p13 = scmp.ne.s32.totalorder %s1221_s13, %s938_s9  ;;  %p942_p0 = scmp.lt.u32.totalorder %s938_s9, %s1221_s13 }
 0x40a   :  { %p944_p1 = pnand %p942_p0, %p939_p13 }
 0x40c   :  { %947 = shalt.err (!%p944_p1)
}
 0x40d   :  { %676 = dma.vmem_to_hbm [thread:$0]  %s674_s20, 128, %s1221_s13, [#allocation7]   ;;  %v730_v24 = vld [vmem:[%s1219_s11] ss:$0 sm:$0xff] }
 0x40e   :  { %s983_s28 = smov [#allocation5]  }
 0x40f   :  { %s663_s29 = sshll.u32 %s983_s28, 4  ;;  %s664_s29 = int_to_ptr.vmem [resolvable:$true] %s663_s29 }
 0x410   :  { %s948_s0 = scalar_lea.vmem %s664_s29, 128  ;;  %p953_p3 = scmp.lt.s32.totalorder %s664_s29, %s664_s29 }
 0x411   :  { %p949_p2 = scmp.ne.s32.totalorder %s664_s29, %s948_s0  ;;  %p954_p4 = scmp.lt.s32.totalorder %s948_s0, %s948_s0 }
 0x413   :  { %p955_p5 = por %p954_p4, %p953_p3 }
 0x415   :  { %p956_p6 = pnand %p955_p5, %p949_p2 }
 0x4d8   :  { %v650_v25 = vpop.f32.mrb[8].mxu0 }
 0x4d9   :  { %v651_v26 = vadd.f32 %v730_v24, %v650_v25  ;;  %v861_v27 = vpop.f32.mrb[9].mxu0 }
 0x4da   :  { %v653_v28 = vpop.f32.mrb[10].mxu0 }
 0x4db   :  { %656 = vst.msk [vmem:[#allocation5] sm:$0xff] %vm68_vm3, %v651_v26  ;;  %v862_v29 = vpop.f32.mrb[11].mxu0 }
 0x4dc   :  { %959 = shalt.err (!%p956_p6)
}
 0x4dd   :  { %s960_s11 = scalar_lea.hbm %s1220_s12, 128 }
 0x4de   :  { %p961_p7 = scmp.ne.s32.totalorder %s1220_s12, %s960_s11  ;;  %p964_p8 = scmp.lt.u32.totalorder %s960_s11, %s1220_s12 }
 0x4e0   :  { %p966_p9 = pnand %p964_p8, %p961_p7 }
 0x4e2   :  { %969 = shalt.err (!%p966_p9)
}
 0x4e3   :  { %666 = dma.vmem_to_hbm [thread:$0]  %s664_s29, 128, %s1220_s12, [#allocation4]  }
 0x4e4   :  { %972 = dma.done.wait [#allocation4], 128  }
 0x4e5   :  { %973 = vsyncadd [#allocation4], 4294967168 }
 0x4e6   :  { %974 = dma.done.wait [#allocation7], 128  }
 0x4e7   :  { %975 = vsyncadd [#allocation7], 4294967168 }
 0x4e8   :  { %683 = vsyncpa [#allocation3], 1 }
 0x4e9   :  { %684 = vsyncpa [#allocation4], 1 }
 0x4ea   :  { %685 = vsyncpa [#allocation7], 1 }

</bundles_post_ra>
